<compile_context>
chip_gen: v5e
topology: v5e:2x2
jax: 0.10.0
libtpu: 0.0.40
codegen_flags: <defaults>
</compile_context>

<pallas_src>
import jax
import jax.numpy as jnp
from jax import lax
from jax.experimental import pallas as pl
from jax.experimental.pallas import tpu as pltpu

H = 768            # BERT hidden size (fixed: classify consumes 4*768 features)
FEAT = 4 * H
EPS = 1e-5         # nn.BatchNorm1d default eps


def entity_link_kernel(se_ref,       # VMEM (TB, 2H)  bf16  [start | end] rows of X1
                       pooled_ref,   # VMEM (TB, H)   bf16  pooled_output
                       wse_ref,      # VMEM (2H, OP)  bf16  folded [W0+W1; W1+W2]
                       wp_ref,       # VMEM (H, OP)   bf16  folded W3 (pooled slice)
                       b_ref,        # VMEM (1, OP)   f32   folded bias
                       out_ref):     # VMEM (TB, OP)  f32
    # EndpointSpanExtractor('x,x+y,y') + cat(pooled) + BatchNorm(eval) + Linear,
    # all folded into two MXU matmuls accumulating in f32.
    acc = jnp.dot(se_ref[...], wse_ref[...], preferred_element_type=jnp.float32)
    acc = acc + jnp.dot(pooled_ref[...], wp_ref[...],
                        preferred_element_type=jnp.float32)
    out_ref[...] = acc + b_ref[...]


def fold_classifier_params(gamma, beta, mean, var, w, bias):
    """One-time (load-time) prep: fold eval-mode BatchNorm1d into the Linear
    layer, pre-sum the weight slices for the 'x,x+y,y' span combination, pad
    the output dim to a lane-dense 128, and cast to bf16 (fold math in f32)."""
    O = w.shape[1]
    o_pad = ((O + 127) // 128) * 128

    g = gamma.reshape(FEAT)
    bt = beta.reshape(FEAT)
    m = mean.reshape(FEAT)
    v = var.reshape(FEAT)

    scale = g * lax.rsqrt(v + EPS)                         # (FEAT,)
    w_fold = w * scale[:, None]                            # (FEAT, O)
    b_fold = bias.reshape(O) + (bt - m * scale) @ w        # (O,)

    # feat = [s, s+e, e, p]  =>  out = s@(W0+W1) + e@(W1+W2) + p@W3 + b
    w0 = w_fold[0 * H:1 * H]
    w1 = w_fold[1 * H:2 * H]
    w2 = w_fold[2 * H:3 * H]
    w3 = w_fold[3 * H:4 * H]
    w_se = jnp.concatenate([w0 + w1, w1 + w2], axis=0)     # (2H, O)

    w_se_p = jnp.zeros((2 * H, o_pad), jnp.float32).at[:, :O].set(w_se)
    w_p_p = jnp.zeros((H, o_pad), jnp.float32).at[:, :O].set(w3)
    b_p = jnp.zeros((1, o_pad), jnp.float32).at[0, :O].set(b_fold)

    return w_se_p.astype(jnp.bfloat16), w_p_p.astype(jnp.bfloat16), b_p


def _round8(n):
    return ((n + 7) // 8) * 8


def entity_link_forward(hidden, pooled, pos, w_se, w_p, b_pad,
                        *, num_outputs=5, tb=512):
    """hidden (B,S,H) f32, pooled (B,H) f32, pos (B,2) int32,
    w_se (2H,OP) bf16, w_p (H,OP) bf16, b_pad (1,OP) f32 -> (B,num_outputs) f32."""
    B, S, h = hidden.shape
    assert h == H
    o_pad = w_se.shape[1]

    # --- wrapper-side prep (cheap, fused XLA ops) ---------------------------
    # Clamp span indices (no bounds checks on TPU VMEM); gather both span rows
    # in one take_along_axis, flatten to (B, 2H), and cast to bf16.
    idx = jnp.clip(pos.astype(jnp.int32), 0, S - 1)                 # (B, 2)
    se = jnp.take_along_axis(hidden, idx[:, :, None], axis=1)       # (B, 2, H)
    se = se.reshape(B, 2 * H).astype(jnp.bfloat16)                  # (B, 2H)
    pooled_b = pooled.astype(jnp.bfloat16)                          # (B, H)

    # Batch tile: big enough to amortize per-step overhead, capped so mid-size
    # batches still give >= 2 grid steps (keeps both v7x TensorCores busy).
    if B <= 8:
        TB = _round8(B)
    else:
        TB = max(8, min(tb, _round8((B + 1) // 2)))
    Bp = pl.cdiv(B, TB) * TB
    if Bp != B:
        padn = Bp - B
        se = jnp.pad(se, ((0, padn), (0, 0)))
        pooled_b = jnp.pad(pooled_b, ((0, padn), (0, 0)))

    # --- pallas_call --------------------------------------------------------
    out = pl.pallas_call(
        entity_link_kernel,
        out_shape=jax.ShapeDtypeStruct((Bp, o_pad), jnp.float32),
        grid=(Bp // TB,),
        in_specs=[
            pl.BlockSpec((TB, 2 * H), lambda i: (i, 0)),    # [start|end] rows
            pl.BlockSpec((TB, H), lambda i: (i, 0)),        # pooled_output
            pl.BlockSpec((2 * H, o_pad), lambda i: (0, 0)),  # folded span weight
            pl.BlockSpec((H, o_pad), lambda i: (0, 0)),      # folded pooled weight
            pl.BlockSpec((1, o_pad), lambda i: (0, 0)),      # folded bias
        ],
        out_specs=pl.BlockSpec((TB, o_pad), lambda i: (i, 0)),
        compiler_params=pltpu.CompilerParams(
            dimension_semantics=("parallel",)),
    )(se, pooled_b, w_se, w_p, b_pad)

    return out[:B, :num_outputs]


def reference(hidden, pooled, pos, gamma, beta, mean, var, w, bias):
    B = hidden.shape[0]
    start = hidden[jnp.arange(B), pos[:, 0]]
    end = hidden[jnp.arange(B), pos[:, 1]]
    span = jnp.concatenate([start, start + end, end], axis=-1)
    feat = jnp.concatenate([span, pooled], axis=-1)
    xn = (feat - mean) * lax.rsqrt(var + EPS) * gamma + beta
    return xn @ w + bias


if __name__ == "__main__":
    B, S, O = 4, 16, 5          # num_outputs=5 per module default
    key = jax.random.PRNGKey(0)
    ks = jax.random.split(key, 10)

    # Synthetic stand-ins for BERT outputs (see TODO at top).
    hidden = jax.random.normal(ks[0], (B, S, H), jnp.float32)       # X1
    pooled = jax.random.normal(ks[1], (B, H), jnp.float32)          # pooled_output

    # pos: one span per example, (start, end) inclusive token indices.
    starts = jax.random.randint(ks[2], (B,), 0, S // 2)
    ends = starts + jax.random.randint(ks[3], (B,), 0, S // 2)
    pos = jnp.stack([starts, ends], axis=-1).astype(jnp.int32)      # (B, 2)

    # classify params: BatchNorm1d(4*768) (eval running stats) + Linear(4*768, 5).
    gamma = 1.0 + 0.1 * jax.random.normal(ks[4], (1, FEAT), jnp.float32)
    beta = 0.1 * jax.random.normal(ks[5], (1, FEAT), jnp.float32)
    mean = 0.1 * jax.random.normal(ks[6], (1, FEAT), jnp.float32)
    var = jax.nn.softplus(jax.random.normal(ks[7], (1, FEAT), jnp.float32)) + 0.5
    w = jax.random.normal(ks[8], (FEAT, O), jnp.float32) / jnp.sqrt(jnp.float32(FEAT))
    bias = 0.01 * jax.random.normal(ks[9], (1, O), jnp.float32)

    # One-time parameter fold (BN -> Linear, span-combination pre-summed, bf16).
    w_se, w_p, b_pad = fold_classifier_params(gamma, beta, mean, var, w, bias)
    w_se, w_p, b_pad = jax.block_until_ready((w_se, w_p, b_pad))

    fwd = jax.jit(entity_link_forward, static_argnames=("num_outputs", "tb"))
    out = fwd(hidden, pooled, pos, w_se, w_p, b_pad, num_outputs=O)
    out = jax.block_until_ready(out)

    ref = reference(hidden, pooled, pos, gamma, beta, mean, var, w, bias)
    assert out.shape == (B, O)
    # bf16 activations/weights (f32 accumulation) vs f32 reference.
    assert jnp.allclose(out, ref, atol=3e-2, rtol=3e-2), (out, ref)
    print("KERNEL_OK")
</pallas_src>

<mosaic_0001>
module attributes {stable_mosaic.version = 11 : i64} {
  func.func @entity_link_kernel(%arg0: i32, %arg1: memref<8x1536xbf16, #tpu.memory_space<vmem>>, %arg2: memref<8x768xbf16, #tpu.memory_space<vmem>>, %arg3: memref<1536x128xbf16, #tpu.memory_space<vmem>>, %arg4: memref<768x128xbf16, #tpu.memory_space<vmem>>, %arg5: memref<1x128xf32, #tpu.memory_space<vmem>>, %arg6: memref<8x128xf32, #tpu.memory_space<vmem>>) attributes {dimension_semantics = [#tpu.dimension_semantics<parallel>], iteration_bounds = array<i64: 1>, scalar_prefetch = 0 : i64, scratch_operands = 0 : i64, tpu.core_type = #tpu.core_type<tc>, window_params = [{transform_indices = @transform_0, window_bounds = array<i64: 8, 1536>}, {transform_indices = @transform_1, window_bounds = array<i64: 8, 768>}, {pipeline_mode = #tpu.pipeline_mode<synchronous>, transform_indices = @transform_2, window_bounds = array<i64: 1536, 128>}, {pipeline_mode = #tpu.pipeline_mode<synchronous>, transform_indices = @transform_3, window_bounds = array<i64: 768, 128>}, {pipeline_mode = #tpu.pipeline_mode<synchronous>, transform_indices = @transform_4, window_bounds = array<i64: 1, 128>}, {transform_indices = @transform_5, window_bounds = array<i64: 8, 128>}]} {
    %c0 = arith.constant 0 : index
    %c0_0 = arith.constant 0 : index
    %0 = vector.load %arg1[%c0, %c0_0] : memref<8x1536xbf16, #tpu.memory_space<vmem>>, vector<8x1536xbf16>
    %c0_1 = arith.constant 0 : index
    %c0_2 = arith.constant 0 : index
    %1 = vector.load %arg3[%c0_1, %c0_2] : memref<1536x128xbf16, #tpu.memory_space<vmem>>, vector<1536x128xbf16>
    %cst = arith.constant dense<0.000000e+00> : vector<8x128xf32>
    %2 = tpu.matmul %0, %1, %cst {dimension_numbers = #tpu.dot_dimension_numbers<[1], [0], [0], [1], [0, 0, 1, 1], [], []>} : vector<8x1536xbf16>, vector<1536x128xbf16>, vector<8x128xf32> -> vector<8x128xf32>
    %c0_3 = arith.constant 0 : index
    %c0_4 = arith.constant 0 : index
    %3 = vector.load %arg2[%c0_3, %c0_4] : memref<8x768xbf16, #tpu.memory_space<vmem>>, vector<8x768xbf16>
    %c0_5 = arith.constant 0 : index
    %c0_6 = arith.constant 0 : index
    %4 = vector.load %arg4[%c0_5, %c0_6] : memref<768x128xbf16, #tpu.memory_space<vmem>>, vector<768x128xbf16>
    %cst_7 = arith.constant dense<0.000000e+00> : vector<8x128xf32>
    %5 = tpu.matmul %3, %4, %cst_7 {dimension_numbers = #tpu.dot_dimension_numbers<[1], [0], [0], [1], [0, 0, 1, 1], [], []>} : vector<8x768xbf16>, vector<768x128xbf16>, vector<8x128xf32> -> vector<8x128xf32>
    %6 = arith.addf %2, %5 : vector<8x128xf32>
    %c0_8 = arith.constant 0 : index
    %c0_9 = arith.constant 0 : index
    %7 = vector.load %arg5[%c0_8, %c0_9] : memref<1x128xf32, #tpu.memory_space<vmem>>, vector<1x128xf32>
    %8 = vector.broadcast %7 : vector<1x128xf32> to vector<8x128xf32>
    %9 = arith.addf %6, %8 : vector<8x128xf32>
    %c0_10 = arith.constant 0 : index
    %c0_11 = arith.constant 0 : index
    %10 = vector.load %arg6[%c0_10, %c0_11] : memref<8x128xf32, #tpu.memory_space<vmem>>, vector<8x128xf32>
    tpu.vector_store %arg6[%c0_10, %c0_11], %9 {strides = array<i32>} : memref<8x128xf32, #tpu.memory_space<vmem>>, vector<8x128xf32>,
    return
  }
  func.func @transform_0(%arg0: i32) -> (i32, i32) {
    %c0_i32 = arith.constant 0 : i32
    %c0_i32_0 = arith.constant 0 : i32
    return %arg0, %c0_i32 : i32, i32
  }
  func.func @transform_1(%arg0: i32) -> (i32, i32) {
    %c0_i32 = arith.constant 0 : i32
    %c0_i32_0 = arith.constant 0 : i32
    return %arg0, %c0_i32 : i32, i32
  }
  func.func @transform_2(%arg0: i32) -> (i32, i32) {
    %c0_i32 = arith.constant 0 : i32
    %c0_i32_0 = arith.constant 0 : i32
    %c0_i32_1 = arith.constant 0 : i32
    return %c0_i32, %c0_i32_0 : i32, i32
  }
  func.func @transform_3(%arg0: i32) -> (i32, i32) {
    %c0_i32 = arith.constant 0 : i32
    %c0_i32_0 = arith.constant 0 : i32
    %c0_i32_1 = arith.constant 0 : i32
    return %c0_i32, %c0_i32_0 : i32, i32
  }
  func.func @transform_4(%arg0: i32) -> (i32, i32) {
    %c0_i32 = arith.constant 0 : i32
    %c0_i32_0 = arith.constant 0 : i32
    %c0_i32_1 = arith.constant 0 : i32
    return %c0_i32, %c0_i32_0 : i32, i32
  }
  func.func @transform_5(%arg0: i32) -> (i32, i32) {
    %c0_i32 = arith.constant 0 : i32
    %c0_i32_0 = arith.constant 0 : i32
    return %arg0, %c0_i32 : i32, i32
  }
}

</mosaic_0001>

<bundles_post_ra>
// kernel: entity_link_forward.1
= control target key start
LH: loop header
LB: loop body
LE: loop exit
PB: predicated region body
PF: predicated region fallthrough
CT: control target
= control target key end

     0   :  { %10 = vsyncpa [#allocation3], 0  ;;  %s2255_s21 = smov [#allocation2]   ;;  %s2256_s23 = smov 64   ;;  %s2468_s0 = inlined_call_operand.vmem [shape: bf16[8,1536], index: 0, kind: input, shape index: {}]   ;;  %s2469_s1 = inlined_call_operand.vmem [shape: bf16[8,768], index: 1, kind: input, shape index: {}]   ;;  %s2470_s2 = inlined_call_operand.hbm [shape: bf16[1536,128], index: 2, kind: input, shape index: {}]   ;;  %s2471_s3 = inlined_call_operand.vmem [shape: bf16[768,128], index: 3, kind: input, shape index: {}]   ;;  %s2472_s4 = inlined_call_operand.vmem [shape: f32[1,128], index: 4, kind: input, shape index: {}]   ;;  %s2473_s5 = inlined_call_operand.vmem [shape: f32[8,128], index: 5, kind: output, shape index: {}]  }
   0x1   :  { %s19_s20 = sshll.u32 %s2470_s2, 4  ;;  %s21_s22 = sshll.u32 %s2255_s21, 4  ;;  %s20_s20 = int_to_ptr.hbm [resolvable:$true] %s19_s20  ;;  %s22_s22 = int_to_ptr.vmem [resolvable:$true] %s21_s22 }
   0x2   :  { %s2257_s24 = smov 4  }
   0x3   :  { %27 = dma.hbm_to_vmem [thread:$0]  %s20_s20, 12288, %s22_s22, [#allocation3], %s2256_s23, %s2256_s23, %s2257_s24  }
   0x4   :  { %2253 = dma.done.wait [#allocation3], 12288  }
   0x5   :  { %2254 = vsyncadd [#allocation3], 4294955008  ;;  %v2184_v0 = vld [vmem:[%s2471_s3 + $0x38] sm:$0xff]  ;;  %v2183_v4 = vld [vmem:[%s2471_s3 + $0x30] sm:$0xff] }
   0x6   :  { %v2192_v1 = vld [vmem:[%s2471_s3 + $0x78] sm:$0xff]  ;;  %642 = vmatpush.bf16.msra.mxu0 %v2184_v0  ;;  %v2191_v5 = vld [vmem:[%s2471_s3 + $0x70] sm:$0xff]  ;;  %v2182_v8 = vld [vmem:[%s2471_s3 + $0x28] sm:$0xff] }
   0x7   :  { %v2200_v2 = vld [vmem:[%s2471_s3 + $0xb8] sm:$0xff]  ;;  %655 = vmatpush.bf16.msra.mxu1 %v2192_v1  ;;  %v2199_v6 = vld [vmem:[%s2471_s3 + $0xb0] sm:$0xff]  ;;  %v2190_v9 = vld [vmem:[%s2471_s3 + $0x68] sm:$0xff] }
   0x8   :  { %v2208_v3 = vld [vmem:[%s2471_s3 + $0xf8] sm:$0xff]  ;;  %668 = vmatpush.bf16.msra.mxu2 %v2200_v2  ;;  %v2207_v7 = vld [vmem:[%s2471_s3 + $0xf0] sm:$0xff]  ;;  %v2198_v10 = vld [vmem:[%s2471_s3 + $0xa8] sm:$0xff] }
   0x9   :  { %681 = vmatpush.bf16.msra.mxu3 %v2208_v3  ;;  %v2206_v11 = vld [vmem:[%s2471_s3 + $0xe8] sm:$0xff]  ;;  %v2181_v12 = vld [vmem:[%s2471_s3 + $0x20] sm:$0xff]  ;;  %v2180_v16 = vld [vmem:[%s2471_s3 + $0x18] sm:$0xff] }
   0xa   :  { %643 = vmatpush.bf16.msra.mxu0 %v2183_v4  ;;  %v2189_v13 = vld [vmem:[%s2471_s3 + $0x60] sm:$0xff]  ;;  %v2188_v17 = vld [vmem:[%s2471_s3 + $0x58] sm:$0xff]  ;;  %v2179_v20 = vld [vmem:[%s2471_s3 + $0x10] sm:$0xff] }
   0xb   :  { %656 = vmatpush.bf16.msra.mxu1 %v2191_v5  ;;  %v2197_v14 = vld [vmem:[%s2471_s3 + $0xa0] sm:$0xff]  ;;  %v2196_v18 = vld [vmem:[%s2471_s3 + $0x98] sm:$0xff]  ;;  %v2187_v21 = vld [vmem:[%s2471_s3 + $0x50] sm:$0xff] }
   0xc   :  { %669 = vmatpush.bf16.msra.mxu2 %v2199_v6  ;;  %v2205_v15 = vld [vmem:[%s2471_s3 + $0xe0] sm:$0xff]  ;;  %v2204_v19 = vld [vmem:[%s2471_s3 + $0xd8] sm:$0xff]  ;;  %v2195_v22 = vld [vmem:[%s2471_s3 + $0x90] sm:$0xff] }
   0xd   :  { %682 = vmatpush.bf16.msra.mxu3 %v2207_v7  ;;  %v2203_v23 = vld [vmem:[%s2471_s3 + $0xd0] sm:$0xff]  ;;  %v2178_v24 = vld [vmem:[%s2471_s3 + $0x8] sm:$0xff]  ;;  %v234_v26 = vld [vmem:[%s2469_s1] sm:$0xff] }
   0xe   :  { %644 = vmatpush.bf16.msra.mxu0 %v2182_v8  ;;  %v2186_v25 = vld [vmem:[%s2471_s3 + $0x48] sm:$0xff]  ;;  %v336_v30 = vunpack.c.l.b16 %v234_v26  ;;  %v2177_v31 = vld [vmem:[%s2471_s3] sm:$0xff]  ;;  %v2216_v35 = vld [vmem:[%s2471_s3 + $0x138] sm:$0xff]  ;;  %v337_v36 = vunpack.c.h.b16 %v234_v26 }
   0xf   :  { %657 = vmatpush.bf16.msra.mxu1 %v2190_v9  ;;  %v2194_v27 = vld [vmem:[%s2471_s3 + $0x88] sm:$0xff]  ;;  %v2185_v32 = vld [vmem:[%s2471_s3 + $0x40] sm:$0xff]  ;;  %v2224_v37 = vld [vmem:[%s2471_s3 + $0x178] sm:$0xff] }
  0x10   :  { %670 = vmatpush.bf16.msra.mxu2 %v2198_v10  ;;  %v2202_v28 = vld [vmem:[%s2471_s3 + $0xc8] sm:$0xff]  ;;  %v2193_v34 = vld [vmem:[%s2471_s3 + $0x80] sm:$0xff]  ;;  %v2088_v38 = vld [vmem:[#allocation2 + $0x38] sm:$0xff]  ;;  %v342_v40 = vpack.c.b16 %v336_v30, %v336_v30  ;;  %v343_v45 = vpack.c.b16 %v337_v36, %v337_v36 }
  0x11   :  { %683 = vmatpush.bf16.msra.mxu3 %v2206_v11  ;;  %v235_v29 = vld [vmem:[%s2469_s1 + $0x8] sm:$0xff]  ;;  %v2201_v39 = vld [vmem:[%s2471_s3 + $0xc0] sm:$0xff]  ;;  %v2096_v42 = vld [vmem:[#allocation2 + $0x78] sm:$0xff] }
  0x12   :  { %645 = vmatpush.bf16.msra.mxu0 %v2181_v12  ;;  %v338_v33 = vunpack.c.l.b16 %v235_v29  ;;  %v339_v41 = vunpack.c.h.b16 %v235_v29  ;;  %v2215_v44 = vld [vmem:[%s2471_s3 + $0x130] sm:$0xff]  ;;  %v2214_v50 = vld [vmem:[%s2471_s3 + $0x128] sm:$0xff]  ;;  %v2213_v54 = vld [vmem:[%s2471_s3 + $0x120] sm:$0xff] }
  0x13   :  { %658 = vmatpush.bf16.msra.mxu1 %v2189_v13  ;;  %v2223_v46 = vld [vmem:[%s2471_s3 + $0x170] sm:$0xff]  ;;  %v2222_v51 = vld [vmem:[%s2471_s3 + $0x168] sm:$0xff]  ;;  %v2221_v55 = vld [vmem:[%s2471_s3 + $0x160] sm:$0xff] }
  0x14   :  { %671 = vmatpush.bf16.msra.mxu2 %v2197_v14  ;;  %v344_v43 = vpack.c.b16 %v338_v33, %v338_v33  ;;  %v2087_v47 = vld [vmem:[#allocation2 + $0x30] sm:$0xff]  ;;  %v345_v48 = vpack.c.b16 %v339_v41, %v339_v41  ;;  %v2086_v52 = vld [vmem:[#allocation2 + $0x28] sm:$0xff]  ;;  %v2085_v56 = vld [vmem:[#allocation2 + $0x20] sm:$0xff] }
  0x15   :  { %684 = vmatpush.bf16.msra.mxu3 %v2205_v15  ;;  %v2095_v49 = vld [vmem:[#allocation2 + $0x70] sm:$0xff]  ;;  %v2094_v53 = vld [vmem:[#allocation2 + $0x68] sm:$0xff]  ;;  %v2093_v57 = vld [vmem:[#allocation2 + $0x60] sm:$0xff] }
  0x16   :  { %646 = vmatpush.bf16.msra.mxu0 %v2180_v16  ;;  %v2212_v58 = vld [vmem:[%s2471_s3 + $0x118] sm:$0xff]  ;;  %v2211_v62 = vld [vmem:[%s2471_s3 + $0x110] sm:$0xff]  ;;  %v2210_v2 = vld [vmem:[%s2471_s3 + $0x108] sm:$0xff] }
  0x17   :  { %659 = vmatpush.bf16.msra.mxu1 %v2188_v17  ;;  %v2220_v59 = vld [vmem:[%s2471_s3 + $0x158] sm:$0xff]  ;;  %v2219_v63 = vld [vmem:[%s2471_s3 + $0x150] sm:$0xff]  ;;  %v2218_v3 = vld [vmem:[%s2471_s3 + $0x148] sm:$0xff] }
  0x18   :  { %672 = vmatpush.bf16.msra.mxu2 %v2196_v18  ;;  %v2084_v60 = vld [vmem:[#allocation2 + $0x18] sm:$0xff]  ;;  %v2083_v0 = vld [vmem:[#allocation2 + $0x10] sm:$0xff]  ;;  %v2082_v4 = vld [vmem:[#allocation2 + $0x8] sm:$0xff] }
  0x19   :  { %685 = vmatpush.bf16.msra.mxu3 %v2204_v19  ;;  %v2092_v61 = vld [vmem:[#allocation2 + $0x58] sm:$0xff]  ;;  %v2091_v1 = vld [vmem:[#allocation2 + $0x50] sm:$0xff]  ;;  %v36_v5 = vld [vmem:[%s2468_s0] sm:$0xff] }
  0x1a   :  { %647 = vmatpush.bf16.msra.mxu0 %v2179_v20  ;;  %v236_v6 = vld [vmem:[%s2469_s1 + $0x10] sm:$0xff]  ;;  %v2090_v7 = vld [vmem:[#allocation2 + $0x48] sm:$0xff]  ;;  %v2209_v8 = vld [vmem:[%s2471_s3 + $0x100] sm:$0xff]  ;;  %v726_v9 = vunpack.c.l.b16 %v36_v5  ;;  %v727_v18 = vunpack.c.h.b16 %v36_v5 }
  0x1b   :  { %660 = vmatpush.bf16.msra.mxu1 %v2187_v21  ;;  %v2217_v10 = vld [vmem:[%s2471_s3 + $0x140] sm:$0xff]  ;;  %v340_v12 = vunpack.c.l.b16 %v236_v6  ;;  %v341_v13 = vunpack.c.h.b16 %v236_v6  ;;  %v2104_v14 = vld [vmem:[#allocation2 + $0xb8] sm:$0xff]  ;;  %v2110_v29 = vld [vmem:[#allocation2 + $0xe8] sm:$0xff] }
  0x1c   :  { %673 = vmatpush.bf16.msra.mxu2 %v2195_v22  ;;  %v2081_v11 = vld [vmem:[#allocation2] sm:$0xff]  ;;  %v2112_v15 = vld [vmem:[#allocation2 + $0xf8] sm:$0xff]  ;;  %v738_v20 = vpack.c.b16 %v726_v9, %v726_v9  ;;  %v739_v26 = vpack.c.b16 %v727_v18, %v727_v18  ;;  %v2118_v30 = vld [vmem:[#allocation2 + $0x128] sm:$0xff] }
  0x1d   :  { %686 = vmatpush.bf16.msra.mxu3 %v2203_v23  ;;  %v2120_v16 = vld [vmem:[#allocation2 + $0x138] sm:$0xff]  ;;  %v2089_v17 = vld [vmem:[#allocation2 + $0x40] sm:$0xff]  ;;  %v346_v21 = vpack.c.b16 %v340_v12, %v340_v12  ;;  %v347_v22 = vpack.c.b16 %v341_v13, %v341_v13  ;;  %v2103_v23 = vld [vmem:[#allocation2 + $0xb0] sm:$0xff] }
  0x1e   :  { %648 = vmatpush.bf16.msra.mxu0 %v2178_v24  ;;  %v2128_v19 = vld [vmem:[#allocation2 + $0x178] sm:$0xff]  ;;  %v2111_v24 = vld [vmem:[#allocation2 + $0xf0] sm:$0xff]  ;;  %v2109_v33 = vld [vmem:[#allocation2 + $0xe0] sm:$0xff] }
  0x1f   :  { %661 = vmatpush.bf16.msra.mxu1 %v2186_v25  ;;  %v2119_v25 = vld [vmem:[#allocation2 + $0x130] sm:$0xff]  ;;  %v2100_v36 = vld [vmem:[#allocation2 + $0x98] sm:$0xff]  ;;  %v2134_v6 = vld [vmem:[#allocation2 + $0x1a8] sm:$0xff] }
  0x20   :  { %674 = vmatpush.bf16.msra.mxu2 %v2194_v27  ;;  %v2127_v27 = vld [vmem:[#allocation2 + $0x170] sm:$0xff]  ;;  %v2158_v9 = vld [vmem:[#allocation2 + $0x268] sm:$0xff]  ;;  %v2149_v12 = vld [vmem:[#allocation2 + $0x220] sm:$0xff] }
  0x21   :  { %687 = vmatpush.bf16.msra.mxu3 %v2202_v28  ;;  %v2102_v28 = vld [vmem:[#allocation2 + $0xa8] sm:$0xff]  ;;  %v2107_v41 = vld [vmem:[#allocation2 + $0xd0] sm:$0xff]  ;;  %v2157_v13 = vld [vmem:[#allocation2 + $0x260] sm:$0xff] }
  0x22   :  { %649 = vmatpush.bf16.msra.mxu0 %v2177_v31  ;;  %v2126_v31 = vld [vmem:[#allocation2 + $0x168] sm:$0xff]  ;;  %v2159_v5 = vld [vmem:[#allocation2 + $0x270] sm:$0xff] }
  0x23   :  { %662 = vmatpush.bf16.msra.mxu1 %v2185_v32  ;;  %v2101_v32 = vld [vmem:[#allocation2 + $0xa0] sm:$0xff]  ;;  %v2131_v18 = vld [vmem:[#allocation2 + $0x190] sm:$0xff] }
  0x24   :  { %675 = vmatpush.bf16.msra.mxu2 %v2193_v34  ;;  %v2117_v34 = vld [vmem:[#allocation2 + $0x120] sm:$0xff] }
  0x25   :  { %688 = vmatpush.bf16.msra.mxu3 %v2201_v39  ;;  %650 = vmatmul.bf16.vlgmr.msra.gmra.mxu0 %v342_v40  ;;  %v2124_v39 = vld [vmem:[#allocation2 + $0x158] sm:$0xff]  ;;  %v2099_v40 = vld [vmem:[#allocation2 + $0x90] sm:$0xff] }
  0x26   :  { %694 = vmatpush.bf16.msrb.mxu0 %v2216_v35  ;;  %663 = vmatmul.bf16.vlgmr.msra.gmra.mxu1 %v343_v45  ;;  %v2125_v35 = vld [vmem:[#allocation2 + $0x160] sm:$0xff]  ;;  %v2106_v45 = vld [vmem:[#allocation2 + $0xc8] sm:$0xff] }
  0x27   :  { %707 = vmatpush.bf16.msrb.mxu1 %v2224_v37  ;;  %676 = vmatmul.bf16.vlgmr.msra.gmra.mxu2 %v344_v43  ;;  %v2108_v37 = vld [vmem:[#allocation2 + $0xd8] sm:$0xff]  ;;  %v2123_v43 = vld [vmem:[#allocation2 + $0x150] sm:$0xff] }
  0x28   :  { %1338 = vmatpush.bf16.msrb.mxu2 %v2088_v38  ;;  %689 = vmatmul.bf16.vlgmr.msra.gmra.mxu3 %v345_v48  ;;  %v2116_v38 = vld [vmem:[#allocation2 + $0x118] sm:$0xff]  ;;  %v38_v48 = vld [vmem:[%s2468_s0 + $0x10] sm:$0xff] }
  0x29   :  { %1351 = vmatpush.bf16.msrb.mxu3 %v2096_v42  ;;  %v2115_v42 = vld [vmem:[#allocation2 + $0x110] sm:$0xff] }
  0x2a   :  { %695 = vmatpush.bf16.msrb.mxu0 %v2215_v44  ;;  %v2098_v44 = vld [vmem:[#allocation2 + $0x88] sm:$0xff] }
  0x2b   :  { %708 = vmatpush.bf16.msrb.mxu1 %v2223_v46  ;;  %v37_v46 = vld [vmem:[%s2468_s0 + $0x8] sm:$0xff] }
  0x2c   :  { %1339 = vmatpush.bf16.msrb.mxu2 %v2087_v47  ;;  %v2114_v47 = vld [vmem:[#allocation2 + $0x108] sm:$0xff] }
  0x2d   :  { %1352 = vmatpush.bf16.msrb.mxu3 %v2095_v49  ;;  %v2122_v49 = vld [vmem:[#allocation2 + $0x148] sm:$0xff] }
  0x2e   :  { %696 = vmatpush.bf16.msrb.mxu0 %v2214_v50  ;;  %v728_v50 = vunpack.c.l.b16 %v37_v46 }
  0x2f   :  { %709 = vmatpush.bf16.msrb.mxu1 %v2222_v51  ;;  %v2097_v51 = vld [vmem:[#allocation2 + $0x80] sm:$0xff] }
  0x30   :  { %1340 = vmatpush.bf16.msrb.mxu2 %v2086_v52  ;;  %v2105_v52 = vld [vmem:[#allocation2 + $0xc0] sm:$0xff] }
  0x31   :  { %1353 = vmatpush.bf16.msrb.mxu3 %v2094_v53  ;;  %v730_v53 = vunpack.c.l.b16 %v38_v48 }
  0x32   :  { %697 = vmatpush.bf16.msrb.mxu0 %v2213_v54  ;;  %v2113_v54 = vld [vmem:[#allocation2 + $0x100] sm:$0xff] }
  0x33   :  { %710 = vmatpush.bf16.msrb.mxu1 %v2221_v55  ;;  %v2136_v55 = vld [vmem:[#allocation2 + $0x1b8] sm:$0xff] }
  0x34   :  { %1341 = vmatpush.bf16.msrb.mxu2 %v2085_v56  ;;  %v729_v56 = vunpack.c.h.b16 %v37_v46  ;;  %v2165_v46 = vld [vmem:[#allocation2 + $0x2a0] sm:$0xff] }
  0x35   :  { %1354 = vmatpush.bf16.msrb.mxu3 %v2093_v57  ;;  %v2144_v57 = vld [vmem:[#allocation2 + $0x1f8] sm:$0xff] }
  0x36   :  { %698 = vmatpush.bf16.msrb.mxu0 %v2212_v58  ;;  %v2152_v58 = vld [vmem:[#allocation2 + $0x238] sm:$0xff] }
  0x37   :  { %711 = vmatpush.bf16.msrb.mxu1 %v2220_v59  ;;  %v731_v59 = vunpack.c.h.b16 %v38_v48  ;;  %v2164_v48 = vld [vmem:[#allocation2 + $0x298] sm:$0xff] }
  0x38   :  { %1342 = vmatpush.bf16.msrb.mxu2 %v2084_v60  ;;  %v2121_v60 = vld [vmem:[#allocation2 + $0x140] sm:$0xff] }
  0x39   :  { %1355 = vmatpush.bf16.msrb.mxu3 %v2092_v61  ;;  %v740_v61 = vpack.c.b16 %v728_v50, %v728_v50  ;;  %v2163_v50 = vld [vmem:[#allocation2 + $0x290] sm:$0xff] }
  0x3a   :  { %699 = vmatpush.bf16.msrb.mxu0 %v2211_v62  ;;  %v742_v62 = vpack.c.b16 %v730_v53, %v730_v53  ;;  %v41_v53 = vld [vmem:[%s2468_s0 + $0x28] sm:$0xff] }
  0x3b   :  { %712 = vmatpush.bf16.msrb.mxu1 %v2219_v63  ;;  %v2160_v63 = vld [vmem:[#allocation2 + $0x278] sm:$0xff] }
  0x3c   :  { %1343 = vmatpush.bf16.msrb.mxu2 %v2083_v0  ;;  %v741_v0 = vpack.c.b16 %v729_v56, %v729_v56  ;;  %v2161_v56 = vld [vmem:[#allocation2 + $0x280] sm:$0xff] }
  0x3d   :  { %1356 = vmatpush.bf16.msrb.mxu3 %v2091_v1  ;;  %v2135_v1 = vld [vmem:[#allocation2 + $0x1b0] sm:$0xff] }
  0x3e   :  { %700 = vmatpush.bf16.msrb.mxu0 %v2210_v2  ;;  %v743_v2 = vpack.c.b16 %v731_v59, %v731_v59 }
  0x3f   :  { %713 = vmatpush.bf16.msrb.mxu1 %v2218_v3  ;;  %v2143_v3 = vld [vmem:[#allocation2 + $0x1f0] sm:$0xff] }
  0x40   :  { %1344 = vmatpush.bf16.msrb.mxu2 %v2082_v4  ;;  %v2151_v4 = vld [vmem:[#allocation2 + $0x230] sm:$0xff] }
  0x41   :  { %1357 = vmatpush.bf16.msrb.mxu3 %v2090_v7  ;;  %v2142_v7 = vld [vmem:[#allocation2 + $0x1e8] sm:$0xff] }
  0x42   :  { %701 = vmatpush.bf16.msrb.mxu0 %v2209_v8  ;;  %v2150_v8 = vld [vmem:[#allocation2 + $0x228] sm:$0xff] }
  0x43   :  { %714 = vmatpush.bf16.msrb.mxu1 %v2217_v10  ;;  %v2133_v10 = vld [vmem:[#allocation2 + $0x1a0] sm:$0xff] }
  0x44   :  { %1345 = vmatpush.bf16.msrb.mxu2 %v2081_v11  ;;  %v2141_v11 = vld [vmem:[#allocation2 + $0x1e0] sm:$0xff] }
  0x45   :  { %1358 = vmatpush.bf16.msrb.mxu3 %v2089_v17  ;;  %702 = vmatmul.bf16.vlgmr.msrb.gmra.mxu0 %v346_v21  ;;  %v2156_v17 = vld [vmem:[#allocation2 + $0x258] sm:$0xff]  ;;  %v2155_v21 = vld [vmem:[#allocation2 + $0x250] sm:$0xff] }
  0x46   :  { %1364 = vmatpush.bf16.msra.mxu0 %v2104_v14  ;;  %715 = vmatmul.bf16.vlgmr.msrb.gmra.mxu1 %v347_v22  ;;  %v2132_v14 = vld [vmem:[#allocation2 + $0x198] sm:$0xff]  ;;  %v2130_v22 = vld [vmem:[#allocation2 + $0x188] sm:$0xff] }
  0x47   :  { %1377 = vmatpush.bf16.msra.mxu1 %v2112_v15  ;;  %1346 = vmatmul.bf16.vlgmr.msrb.gmra.mxu2 %v738_v20  ;;  %v2140_v15 = vld [vmem:[#allocation2 + $0x1d8] sm:$0xff]  ;;  %v2147_v20 = vld [vmem:[#allocation2 + $0x210] sm:$0xff] }
  0x48   :  { %1390 = vmatpush.bf16.msra.mxu2 %v2120_v16  ;;  %1359 = vmatmul.bf16.vlgmr.msrb.gmra.mxu3 %v739_v26  ;;  %v2148_v16 = vld [vmem:[#allocation2 + $0x218] sm:$0xff]  ;;  %v40_v26 = vld [vmem:[%s2468_s0 + $0x20] sm:$0xff] }
  0x49   :  { %1403 = vmatpush.bf16.msra.mxu3 %v2128_v19  ;;  %v2139_v19 = vld [vmem:[#allocation2 + $0x1d0] sm:$0xff] }
  0x4a   :  { %1365 = vmatpush.bf16.msra.mxu0 %v2103_v23  ;;  %v39_v23 = vld [vmem:[%s2468_s0 + $0x18] sm:$0xff] }
  0x4b   :  { %1378 = vmatpush.bf16.msra.mxu1 %v2111_v24  ;;  %v2138_v24 = vld [vmem:[#allocation2 + $0x1c8] sm:$0xff] }
  0x4c   :  { %1391 = vmatpush.bf16.msra.mxu2 %v2119_v25  ;;  %v2146_v25 = vld [vmem:[#allocation2 + $0x208] sm:$0xff] }
  0x4d   :  { %1404 = vmatpush.bf16.msra.mxu3 %v2127_v27  ;;  %v2154_v27 = vld [vmem:[#allocation2 + $0x248] sm:$0xff] }
  0x4e   :  { %1366 = vmatpush.bf16.msra.mxu0 %v2102_v28  ;;  %v732_v28 = vunpack.c.l.b16 %v39_v23 }
  0x4f   :  { %1379 = vmatpush.bf16.msra.mxu1 %v2110_v29  ;;  %v2129_v29 = vld [vmem:[#allocation2 + $0x180] sm:$0xff] }
  0x50   :  { %1392 = vmatpush.bf16.msra.mxu2 %v2118_v30  ;;  %v733_v30 = vunpack.c.h.b16 %v39_v23 }
  0x51   :  { %1405 = vmatpush.bf16.msra.mxu3 %v2126_v31  ;;  %v2137_v31 = vld [vmem:[#allocation2 + $0x1c0] sm:$0xff] }
  0x52   :  { %1367 = vmatpush.bf16.msra.mxu0 %v2101_v32  ;;  %v2168_v32 = vld [vmem:[#allocation2 + $0x2b8] sm:$0xff] }
  0x53   :  { %1380 = vmatpush.bf16.msra.mxu1 %v2109_v33  ;;  %v734_v33 = vunpack.c.l.b16 %v40_v26 }
  0x54   :  { %1393 = vmatpush.bf16.msra.mxu2 %v2117_v34  ;;  %v2145_v34 = vld [vmem:[#allocation2 + $0x200] sm:$0xff] }
  0x55   :  { %1406 = vmatpush.bf16.msra.mxu3 %v2125_v35  ;;  %v2176_v35 = vld [vmem:[#allocation2 + $0x2f8] sm:$0xff] }
  0x56   :  { %1368 = vmatpush.bf16.msra.mxu0 %v2100_v36  ;;  %v735_v36 = vunpack.c.h.b16 %v40_v26 }
  0x57   :  { %1381 = vmatpush.bf16.msra.mxu1 %v2108_v37  ;;  %v2153_v37 = vld [vmem:[#allocation2 + $0x240] sm:$0xff] }
  0x58   :  { %1394 = vmatpush.bf16.msra.mxu2 %v2116_v38  ;;  %v744_v38 = vpack.c.b16 %v732_v28, %v732_v28 }
  0x59   :  { %1407 = vmatpush.bf16.msra.mxu3 %v2124_v39  ;;  %v745_v39 = vpack.c.b16 %v733_v30, %v733_v30 }
  0x5a   :  { %1369 = vmatpush.bf16.msra.mxu0 %v2099_v40  ;;  %v746_v40 = vpack.c.b16 %v734_v33, %v734_v33 }
  0x5b   :  { %1382 = vmatpush.bf16.msra.mxu1 %v2107_v41  ;;  %v2167_v41 = vld [vmem:[#allocation2 + $0x2b0] sm:$0xff] }
  0x5c   :  { %1395 = vmatpush.bf16.msra.mxu2 %v2115_v42  ;;  %v747_v42 = vpack.c.b16 %v735_v36, %v735_v36 }
  0x5d   :  { %1408 = vmatpush.bf16.msra.mxu3 %v2123_v43  ;;  %v2175_v43 = vld [vmem:[#allocation2 + $0x2f0] sm:$0xff] }
  0x5e   :  { %1370 = vmatpush.bf16.msra.mxu0 %v2098_v44  ;;  %v2166_v44 = vld [vmem:[#allocation2 + $0x2a8] sm:$0xff] }
  0x5f   :  { %1383 = vmatpush.bf16.msra.mxu1 %v2106_v45  ;;  %v2174_v45 = vld [vmem:[#allocation2 + $0x2e8] sm:$0xff] }
  0x60   :  { %1396 = vmatpush.bf16.msra.mxu2 %v2114_v47  ;;  %v2173_v47 = vld [vmem:[#allocation2 + $0x2e0] sm:$0xff] }
  0x61   :  { %1409 = vmatpush.bf16.msra.mxu3 %v2122_v49  ;;  %v2172_v49 = vld [vmem:[#allocation2 + $0x2d8] sm:$0xff] }
  0x62   :  { %1371 = vmatpush.bf16.msra.mxu0 %v2097_v51  ;;  %v2171_v51 = vld [vmem:[#allocation2 + $0x2d0] sm:$0xff] }
  0x63   :  { %1384 = vmatpush.bf16.msra.mxu1 %v2105_v52  ;;  %v2162_v52 = vld [vmem:[#allocation2 + $0x288] sm:$0xff] }
  0x64   :  { %1397 = vmatpush.bf16.msra.mxu2 %v2113_v54  ;;  %v2170_v54 = vld [vmem:[#allocation2 + $0x2c8] sm:$0xff] }
  0x65   :  { %1410 = vmatpush.bf16.msra.mxu3 %v2121_v60  ;;  %1372 = vmatmul.bf16.vlgmr.msra.gmra.mxu0 %v740_v61 }
  0x66   :  { %1416 = vmatpush.bf16.msrb.mxu0 %v2136_v55  ;;  %1385 = vmatmul.bf16.vlgmr.msra.gmra.mxu1 %v741_v0  ;;  %v736_v55 = vunpack.c.l.b16 %v41_v53 }
  0x67   :  { %1429 = vmatpush.bf16.msrb.mxu1 %v2144_v57  ;;  %1398 = vmatmul.bf16.vlgmr.msra.gmra.mxu2 %v742_v62  ;;  %v737_v57 = vunpack.c.h.b16 %v41_v53 }
  0x68   :  { %1442 = vmatpush.bf16.msrb.mxu2 %v2152_v58  ;;  %1411 = vmatmul.bf16.vlgmr.msra.gmra.mxu3 %v743_v2  ;;  %v2169_v58 = vld [vmem:[#allocation2 + $0x2c0] sm:$0xff]  ;;  %v748_v59 = vpack.c.b16 %v736_v55, %v736_v55 }
  0x69   :  { %1455 = vmatpush.bf16.msrb.mxu3 %v2160_v63  ;;  %v749_v60 = vpack.c.b16 %v737_v57, %v737_v57 }
  0x6a   :  { %1417 = vmatpush.bf16.msrb.mxu0 %v2135_v1 }
  0x6b   :  { %1430 = vmatpush.bf16.msrb.mxu1 %v2143_v3 }
  0x6c   :  { %1443 = vmatpush.bf16.msrb.mxu2 %v2151_v4 }
  0x6d   :  { %1456 = vmatpush.bf16.msrb.mxu3 %v2159_v5 }
  0x6e   :  { %1418 = vmatpush.bf16.msrb.mxu0 %v2134_v6 }
  0x6f   :  { %1431 = vmatpush.bf16.msrb.mxu1 %v2142_v7 }
  0x70   :  { %1444 = vmatpush.bf16.msrb.mxu2 %v2150_v8 }
  0x71   :  { %1457 = vmatpush.bf16.msrb.mxu3 %v2158_v9 }
  0x72   :  { %1419 = vmatpush.bf16.msrb.mxu0 %v2133_v10 }
  0x73   :  { %1432 = vmatpush.bf16.msrb.mxu1 %v2141_v11 }
  0x74   :  { %1445 = vmatpush.bf16.msrb.mxu2 %v2149_v12 }
  0x75   :  { %1458 = vmatpush.bf16.msrb.mxu3 %v2157_v13 }
  0x76   :  { %1420 = vmatpush.bf16.msrb.mxu0 %v2132_v14 }
  0x77   :  { %1433 = vmatpush.bf16.msrb.mxu1 %v2140_v15 }
  0x78   :  { %1446 = vmatpush.bf16.msrb.mxu2 %v2148_v16 }
  0x79   :  { %1459 = vmatpush.bf16.msrb.mxu3 %v2156_v17 }
  0x7a   :  { %1421 = vmatpush.bf16.msrb.mxu0 %v2131_v18 }
  0x7b   :  { %1434 = vmatpush.bf16.msrb.mxu1 %v2139_v19 }
  0x7c   :  { %1447 = vmatpush.bf16.msrb.mxu2 %v2147_v20 }
  0x7d   :  { %1460 = vmatpush.bf16.msrb.mxu3 %v2155_v21 }
  0x7e   :  { %1422 = vmatpush.bf16.msrb.mxu0 %v2130_v22 }
  0x7f   :  { %1435 = vmatpush.bf16.msrb.mxu1 %v2138_v24 }
  0x80   :  { %1448 = vmatpush.bf16.msrb.mxu2 %v2146_v25 }
  0x81   :  { %1461 = vmatpush.bf16.msrb.mxu3 %v2154_v27 }
  0x82   :  { %1423 = vmatpush.bf16.msrb.mxu0 %v2129_v29 }
  0x83   :  { %1436 = vmatpush.bf16.msrb.mxu1 %v2137_v31 }
  0x84   :  { %1449 = vmatpush.bf16.msrb.mxu2 %v2145_v34 }
  0x85   :  { %1462 = vmatpush.bf16.msrb.mxu3 %v2153_v37  ;;  %1424 = vmatmul.bf16.vlgmr.msrb.gmra.mxu0 %v744_v38 }
  0x86   :  { %1468 = vmatpush.bf16.msra.mxu0 %v2168_v32  ;;  %1437 = vmatmul.bf16.vlgmr.msrb.gmra.mxu1 %v745_v39 }
  0x87   :  { %1481 = vmatpush.bf16.msra.mxu1 %v2176_v35  ;;  %1450 = vmatmul.bf16.vlgmr.msrb.gmra.mxu2 %v746_v40 }
  0x88   :  { %1463 = vmatmul.bf16.vlgmr.msrb.gmra.mxu3 %v747_v42 }
  0x8a   :  { %1469 = vmatpush.bf16.msra.mxu0 %v2167_v41 }
  0x8b   :  { %1482 = vmatpush.bf16.msra.mxu1 %v2175_v43 }
  0x8e   :  { %1470 = vmatpush.bf16.msra.mxu0 %v2166_v44 }
  0x8f   :  { %1483 = vmatpush.bf16.msra.mxu1 %v2174_v45 }
  0x92   :  { %1471 = vmatpush.bf16.msra.mxu0 %v2165_v46 }
  0x93   :  { %1484 = vmatpush.bf16.msra.mxu1 %v2173_v47  ;;  %v2228_v47 = vld [vmem:[%s2472_s4] ss:$0 sm:$0xff] }
  0x96   :  { %1472 = vmatpush.bf16.msra.mxu0 %v2164_v48 }
  0x97   :  { %1485 = vmatpush.bf16.msra.mxu1 %v2172_v49 }
  0x9a   :  { %1473 = vmatpush.bf16.msra.mxu0 %v2163_v50 }
  0x9b   :  { %1486 = vmatpush.bf16.msra.mxu1 %v2171_v51 }
  0x9e   :  { %1474 = vmatpush.bf16.msra.mxu0 %v2162_v52 }
  0x9f   :  { %1487 = vmatpush.bf16.msra.mxu1 %v2170_v54 }
  0xa2   :  { %1475 = vmatpush.bf16.msra.mxu0 %v2161_v56  ;;  %v651_v61 = vpop.f32.mrf.mxu0 }
  0xa3   :  { %1488 = vmatpush.bf16.msra.mxu1 %v2169_v58  ;;  %v664_v62 = vpop.f32.mrf.mxu1 }
  0xa4   :  { %v665_v63 = vadd.f32 %v664_v62, %v651_v61 }
  0xa5   :  { %1476 = vmatmul.bf16.vlgmr.msra.gmra.mxu0 %v748_v59 }
  0xa6   :  { %1489 = vmatmul.bf16.vlgmr.msra.gmra.mxu1 %v749_v60 }
  0xaa   :  { %v677_v0 = vpop.f32.mrf.mxu2  ;;  %v653_v2 = vpop.f32.mrf.mxu0 }
  0xab   :  { %v678_v1 = vadd.f32 %v677_v0, %v665_v63  ;;  %v690_v3 = vpop.f32.mrf.mxu3  ;;  %v666_v4 = vpop.f32.mrf.mxu1 }
  0xad   :  { %v691_v5 = vadd.f32 %v690_v3, %v678_v1 }
  0xb2   :  { %v679_v6 = vpop.f32.mrf.mxu2 }
  0xb3   :  { %v692_v7 = vpop.f32.mrf.mxu3 }
  0xc2   :  { %v703_v8 = vpop.f32.mrf.mxu0 }
  0xc3   :  { %v716_v9 = vpop.f32.mrf.mxu1  ;;  %v704_v24 = vadd.f32 %v703_v8, %v691_v5 }
  0xc5   :  { %v717_v25 = vadd.f32 %v716_v9, %v704_v24 }
  0xca   :  { %v1347_v10 = vpop.f32.mrf.mxu2  ;;  %v705_v12 = vpop.f32.mrf.mxu0 }
  0xcb   :  { %v1360_v11 = vpop.f32.mrf.mxu3  ;;  %v718_v13 = vpop.f32.mrf.mxu1  ;;  %v1348_v26 = vadd.f32 %v1347_v10, %v717_v25 }
  0xcd   :  { %v1361_v29 = vadd.f32 %v1360_v11, %v1348_v26 }
  0xd2   :  { %v1349_v14 = vpop.f32.mrf.mxu2 }
  0xd3   :  { %v1362_v15 = vpop.f32.mrf.mxu3 }
  0xe2   :  { %v1373_v16 = vpop.f32.mrf.mxu0 }
  0xe3   :  { %v1386_v17 = vpop.f32.mrf.mxu1  ;;  %v1374_v30 = vadd.f32 %v1373_v16, %v1361_v29 }
  0xe5   :  { %v1387_v35 = vadd.f32 %v1386_v17, %v1374_v30 }
  0xea   :  { %v1399_v18 = vpop.f32.mrf.mxu2  ;;  %v1375_v19 = vpop.f32.mrf.mxu0 }
  0xeb   :  { %v1412_v20 = vpop.f32.mrf.mxu3  ;;  %v1388_v21 = vpop.f32.mrf.mxu1  ;;  %v1400_v36 = vadd.f32 %v1399_v18, %v1387_v35 }
  0xed   :  { %v1413_v37 = vadd.f32 %v1412_v20, %v1400_v36 }
  0xf2   :  { %v1401_v22 = vpop.f32.mrf.mxu2 }
  0xf3   :  { %v1414_v23 = vpop.f32.mrf.mxu3 }
 0x102   :  { %v1425_v27 = vpop.f32.mrf.mxu0 }
 0x103   :  { %v1438_v28 = vpop.f32.mrf.mxu1  ;;  %v1426_v40 = vadd.f32 %v1425_v27, %v1413_v37 }
 0x105   :  { %v1439_v41 = vadd.f32 %v1438_v28, %v1426_v40 }
 0x10a   :  { %v1451_v31 = vpop.f32.mrf.mxu2  ;;  %v1427_v32 = vpop.f32.mrf.mxu0 }
 0x10b   :  { %v1464_v33 = vpop.f32.mrf.mxu3  ;;  %v1440_v34 = vpop.f32.mrf.mxu1  ;;  %v1452_v42 = vadd.f32 %v1451_v31, %v1439_v41 }
 0x10d   :  { %v1465_v43 = vadd.f32 %v1464_v33, %v1452_v42 }
 0x112   :  { %v1453_v38 = vpop.f32.mrf.mxu2 }
 0x113   :  { %v1466_v39 = vpop.f32.mrf.mxu3 }
 0x122   :  { %v1477_v44 = vpop.f32.mrf.mxu0 }
 0x123   :  { %v1478_v45 = vadd.f32 %v1477_v44, %v1465_v43  ;;  %v1490_v46 = vpop.f32.mrf.mxu1 }
 0x125   :  { %v1491_v48 = vadd.f32 %v1490_v46, %v1478_v45 }
 0x127   :  { %v1498_v49 = vadd.f32 %v2228_v47, %v1491_v48 }
 0x129   :  { %1499 = vst [vmem:[%s2473_s5] sm:$0xff] %v1498_v49 }
 0x12a   :  { %v1479_v50 = vpop.f32.mrf.mxu0 }
 0x12b   :  { %v1492_v51 = vpop.f32.mrf.mxu1 }
 0x12c   :  { %1504 = vsyncpa [#allocation3], 1 }

</bundles_post_ra>
